<compile_context>
chip_gen: v7x
topology: tpu7x:2x2x1
jax: 0.10.0
libtpu: 0.0.40
codegen_flags: <defaults>
</compile_context>

<pallas_src>
import jax
import jax.numpy as jnp
from jax.experimental import pallas as pl
from jax.experimental.pallas import tpu as pltpu


def _log_sigmoid(x):
    # Stable log(sigmoid(x)) = min(x, 0) - log1p(exp(-|x|)); never hits log(0).
    return jnp.minimum(x, 0.0) - jnp.log1p(jnp.exp(-jnp.abs(x)))


def _round_up(x, m):
    return -(-x // m) * m


def _vmem_capacity_bytes():
    # Trace-time hardware query; fall back to the smallest generation (v7x).
    try:
        return int(pltpu.get_tpu_info().vmem_capacity_bytes)
    except Exception:
        return 64 * 1024 * 1024


def _make_kernel(batch_size, block_b):
    def kernel(in_ref, out_ref, noise_ref, partial_ref):
        i = pl.program_id(0)

        inp = in_ref[...]        # (TB, D), native dtype
        outv = out_ref[...]      # (TB, D), native dtype
        noise = noise_ref[...]   # (TB, N, D), native dtype

        # Positive term (tiny relative to the noise term): f32 VPU path.
        inp_f32 = inp.astype(jnp.float32)
        pos_score = jnp.sum(inp_f32 * outv.astype(jnp.float32),
                            axis=-1, keepdims=True)                 # (TB, 1)
        pos_term = _log_sigmoid(pos_score)                          # (TB, 1)

        # Negative term: multiply in the input dtype, accumulate the D
        # reduction in f32 (no explicit full-tile f32 copy of the noise data).
        # Only the (TB, N) score is negated, not the (TB, N, D) tensor.
        # TODO(synk): on v7x the cross-lane (XLU) D-reduce can bind before HBM;
        # an MXU ones-matrix reduce is a candidate once bundle-verified.
        neg_score = jnp.sum(noise * inp[:, None, :], axis=-1,
                            dtype=jnp.float32)                      # (TB, N)
        neg_term = jnp.sum(_log_sigmoid(-neg_score),
                           axis=-1, keepdims=True)                  # (TB, 1)

        total = pos_term + neg_term                                 # (TB, 1)

        # Mask rows past the true batch size (last, padded block) BEFORE the
        # block-level reduction — out-of-range rows may hold stale VMEM.
        row_ids = i * block_b + jax.lax.broadcasted_iota(
            jnp.int32, (block_b, 1), 0)
        total = jnp.where(row_ids < batch_size, total, 0.0)

        # Raw per-block partial sum; -1/B scaling happens once in the wrapper
        # so the grid axis stays fully parallel.
        partial = jnp.sum(total)
        partial_ref[...] = jnp.full(partial_ref.shape, partial, jnp.float32)

    return kernel


def negative_sampling_loss(input_vectors, output_vectors, noise_vectors):
    """input_vectors: (B, D), output_vectors: (B, D), noise_vectors: (B, N, D)."""
    B, D = input_vectors.shape
    Bn, N, Dn = noise_vectors.shape
    assert Bn == B and Dn == D and output_vectors.shape == (B, D)

    itemsize = jnp.dtype(noise_vectors.dtype).itemsize
    d_pad = _round_up(D, 128)    # lane padding of the embedding axis
    n_pad = _round_up(N, 8)      # sublane padding of the noise axis

    # --- Generation-aware VMEM budget.
    #   v5e/v6e: 128 MiB physical  -> 96 MiB scoped limit.
    #   v7x    :  64 MiB physical  -> 48 MiB scoped limit (>=16 MiB headroom).
    vmem_cap = _vmem_capacity_bytes()
    vmem_limit = 96 * 1024 * 1024 if vmem_cap >= 100 * 1024 * 1024 else 48 * 1024 * 1024
    usable = int(vmem_limit * 0.80)   # headroom for output blocks / compiler scratch

    # Per batch-row VMEM footprint: double-buffered DMA tiles in the input
    # dtype + one f32 product temporary the size of the noise tile.
    tile_row = itemsize * (n_pad * d_pad + 2 * d_pad)
    temp_row = 4 * n_pad * d_pad
    per_row = 2 * tile_row + temp_row
    tb_cap = max(8, (usable // per_row) // 8 * 8)

    # --- Block split: prefer >= 2 (even) roughly equal blocks so the
    # "parallel" batch axis keeps both v7x TensorCores busy.
    if B <= 8:
        block_b = B
    else:
        nb = max(2, -(-B // tb_cap))
        if nb % 2:
            nb += 1
        block_b = min(_round_up(-(-B // nb), 8), tb_cap)
    num_blocks = -(-B // block_b)

    cost = pl.CostEstimate(
        flops=2 * B * (N + 1) * D,
        transcendentals=2 * B * (N + 1),
        bytes_accessed=itemsize * B * D * (N + 2) + 4 * num_blocks * 8 * 128,
    )

    partials = pl.pallas_call(
        _make_kernel(B, block_b),
        out_shape=jax.ShapeDtypeStruct((num_blocks, 8, 128), jnp.float32),
        grid=(num_blocks,),
        in_specs=[
            pl.BlockSpec((block_b, D), lambda i: (i, 0)),
            pl.BlockSpec((block_b, D), lambda i: (i, 0)),
            pl.BlockSpec((block_b, N, D), lambda i: (i, 0, 0)),
        ],
        out_specs=pl.BlockSpec((1, 8, 128), lambda i: (i, 0, 0)),
        compiler_params=pltpu.CompilerParams(
            dimension_semantics=("parallel",),
            vmem_limit_bytes=vmem_limit,
        ),
        cost_estimate=cost,
    )(input_vectors, output_vectors, noise_vectors)

    # Finalize once: sum of per-block partial sums, negate, divide by B.
    return -jnp.sum(partials[:, 0, 0]) / B


def _reference_loss(input_vectors, output_vectors, noise_vectors):
    pos = jnp.sum(input_vectors * output_vectors, axis=-1)
    out_loss = jax.nn.log_sigmoid(pos)
    neg = jnp.einsum("bnd,bd->bn", noise_vectors, input_vectors)
    noise_loss = jnp.sum(jax.nn.log_sigmoid(-neg), axis=-1)
    return -jnp.mean(out_loss + noise_loss)


if __name__ == "__main__":
    B, N, D = 8, 5, 32  # batch, #negative samples, embedding size
    key = jax.random.PRNGKey(0)
    k1, k2, k3 = jax.random.split(key, 3)
    input_vectors = jax.random.normal(k1, (B, D), dtype=jnp.float32)
    output_vectors = jax.random.normal(k2, (B, D), dtype=jnp.float32)
    noise_vectors = jax.random.normal(k3, (B, N, D), dtype=jnp.float32)

    loss = negative_sampling_loss(input_vectors, output_vectors, noise_vectors)
    jax.block_until_ready(loss)

    ref = _reference_loss(input_vectors, output_vectors, noise_vectors)
    assert jnp.allclose(loss, ref, rtol=1e-5, atol=1e-5), (loss, ref)

    print("KERNEL_OK")
</pallas_src>

<mosaic_0001>
module attributes {stable_mosaic.version = 11 : i64} {
  func.func @kernel(%arg0: i32, %arg1: memref<8x32xf32, #tpu.memory_space<vmem>>, %arg2: memref<8x32xf32, #tpu.memory_space<vmem>>, %arg3: memref<8x5x32xf32, #tpu.memory_space<vmem>>, %arg4: memref<1x8x128xf32, #tpu.memory_space<vmem>>) attributes {dimension_semantics = [#tpu.dimension_semantics<parallel>], iteration_bounds = array<i64: 1>, scalar_prefetch = 0 : i64, scratch_operands = 0 : i64, tpu.core_type = #tpu.core_type<tc>, window_params = [{transform_indices = @transform_0, window_bounds = array<i64: 8, 32>}, {transform_indices = @transform_1, window_bounds = array<i64: 8, 32>}, {transform_indices = @transform_2, window_bounds = array<i64: 8, 5, 32>}, {transform_indices = @transform_3, window_bounds = array<i64: 1, 8, 128>}]} {
    %c0 = arith.constant 0 : index
    %c0_0 = arith.constant 0 : index
    %0 = vector.load %arg1[%c0, %c0_0] : memref<8x32xf32, #tpu.memory_space<vmem>>, vector<8x32xf32>
    %c0_1 = arith.constant 0 : index
    %c0_2 = arith.constant 0 : index
    %1 = vector.load %arg2[%c0_1, %c0_2] : memref<8x32xf32, #tpu.memory_space<vmem>>, vector<8x32xf32>
    %c0_3 = arith.constant 0 : index
    %c0_4 = arith.constant 0 : index
    %c0_5 = arith.constant 0 : index
    %2 = vector.load %arg3[%c0_3, %c0_4, %c0_5] : memref<8x5x32xf32, #tpu.memory_space<vmem>>, vector<8x5x32xf32>
    %3 = arith.mulf %0, %1 : vector<8x32xf32>
    %cst = arith.constant dense<0.000000e+00> : vector<8xf32>
    %4 = vector.multi_reduction <add>, %3, %cst [1] : vector<8x32xf32> to vector<8xf32>
    %5 = vector.shape_cast %4 : vector<8xf32> to vector<8x1xf32>
    %cst_6 = arith.constant 0.000000e+00 : f32
    %6 = vector.broadcast %cst_6 : f32 to vector<8x1xf32>
    %7 = arith.minimumf %5, %6 : vector<8x1xf32>
    %8 = math.absf %5 : vector<8x1xf32>
    %cst_7 = arith.constant 0.000000e+00 : f32
    %9 = vector.broadcast %cst_7 : f32 to vector<8x1xf32>
    %10 = arith.subf %9, %8 : vector<8x1xf32>
    %11 = math.exp %10 : vector<8x1xf32>
    %12 = math.log1p %11 : vector<8x1xf32>
    %13 = arith.subf %7, %12 : vector<8x1xf32>
    %14 = vector.shape_cast %0 : vector<8x32xf32> to vector<8x1x32xf32>
    %15 = vector.broadcast %14 : vector<8x1x32xf32> to vector<8x5x32xf32>
    %16 = arith.mulf %2, %15 : vector<8x5x32xf32>
    %cst_8 = arith.constant dense<0.000000e+00> : vector<8x5xf32>
    %17 = vector.multi_reduction <add>, %16, %cst_8 [2] : vector<8x5x32xf32> to vector<8x5xf32>
    %cst_9 = arith.constant 0.000000e+00 : f32
    %18 = vector.broadcast %cst_9 : f32 to vector<8x5xf32>
    %19 = arith.subf %18, %17 : vector<8x5xf32>
    %cst_10 = arith.constant 0.000000e+00 : f32
    %20 = vector.broadcast %cst_10 : f32 to vector<8x5xf32>
    %21 = arith.minimumf %19, %20 : vector<8x5xf32>
    %22 = math.absf %19 : vector<8x5xf32>
    %cst_11 = arith.constant 0.000000e+00 : f32
    %23 = vector.broadcast %cst_11 : f32 to vector<8x5xf32>
    %24 = arith.subf %23, %22 : vector<8x5xf32>
    %25 = math.exp %24 : vector<8x5xf32>
    %26 = math.log1p %25 : vector<8x5xf32>
    %27 = arith.subf %21, %26 : vector<8x5xf32>
    %cst_12 = arith.constant dense<0.000000e+00> : vector<8xf32>
    %28 = vector.multi_reduction <add>, %27, %cst_12 [1] : vector<8x5xf32> to vector<8xf32>
    %29 = vector.shape_cast %28 : vector<8xf32> to vector<8x1xf32>
    %30 = arith.addf %13, %29 : vector<8x1xf32>
    %c8_i32 = arith.constant 8 : i32
    %31 = arith.muli %arg0, %c8_i32 : i32
    %32 = tpu.iota {dimensions = array<i32: 0>} : vector<8x1xi32>
    %33 = vector.broadcast %31 : i32 to vector<8x1xi32>
    %34 = arith.addi %33, %32 : vector<8x1xi32>
    %c8_i32_13 = arith.constant 8 : i32
    %35 = vector.broadcast %c8_i32_13 : i32 to vector<8x1xi32>
    %36 = arith.cmpi slt, %34, %35 : vector<8x1xi32>
    %cst_14 = arith.constant 0.000000e+00 : f32
    %37 = vector.broadcast %cst_14 : f32 to vector<8x1xf32>
    %38 = arith.select %36, %30, %37 : vector<8x1xi1>, vector<8x1xf32>
    %39 = vector.shape_cast %38 : vector<8x1xf32> to vector<1x8x1xf32>
    %cst_15 = arith.constant dense<0.000000e+00> : vector<1xf32>
    %40 = vector.multi_reduction <add>, %39, %cst_15 [1, 2] : vector<1x8x1xf32> to vector<1xf32>
    %41 = vector.shape_cast %40 : vector<1xf32> to vector<1x1x1xf32>
    %42 = vector.extract %41[0, 0, 0] : f32 from vector<1x1x1xf32>
    %43 = vector.broadcast %42 : f32 to vector<1x8x128xf32>
    %c0_16 = arith.constant 0 : index
    %c0_17 = arith.constant 0 : index
    %c0_18 = arith.constant 0 : index
    %44 = vector.load %arg4[%c0_16, %c0_17, %c0_18] : memref<1x8x128xf32, #tpu.memory_space<vmem>>, vector<1x8x128xf32>
    tpu.vector_store %arg4[%c0_16, %c0_17, %c0_18], %43 {strides = array<i32>} : memref<1x8x128xf32, #tpu.memory_space<vmem>>, vector<1x8x128xf32>,
    return
  }
  func.func @transform_0(%arg0: i32) -> (i32, i32) {
    %c0_i32 = arith.constant 0 : i32
    %c0_i32_0 = arith.constant 0 : i32
    return %arg0, %c0_i32 : i32, i32
  }
  func.func @transform_1(%arg0: i32) -> (i32, i32) {
    %c0_i32 = arith.constant 0 : i32
    %c0_i32_0 = arith.constant 0 : i32
    return %arg0, %c0_i32 : i32, i32
  }
  func.func @transform_2(%arg0: i32) -> (i32, i32, i32) {
    %c0_i32 = arith.constant 0 : i32
    %c0_i32_0 = arith.constant 0 : i32
    %c0_i32_1 = arith.constant 0 : i32
    return %arg0, %c0_i32, %c0_i32_0 : i32, i32, i32
  }
  func.func @transform_3(%arg0: i32) -> (i32, i32, i32) {
    %c0_i32 = arith.constant 0 : i32
    %c0_i32_0 = arith.constant 0 : i32
    %c0_i32_1 = arith.constant 0 : i32
    return %arg0, %c0_i32, %c0_i32_0 : i32, i32, i32
  }
}

</mosaic_0001>

<bundles_post_ra>
// kernel: tpu_custom_call.1
= control target key start
LH: loop header
LB: loop body
LE: loop exit
PB: predicated region body
PF: predicated region fallthrough
CT: control target
= control target key end

     0   :  { %v50_v0 = vlaneseq  ;;  %v457_v1 = vmov 1966171168   ;;  %s654_s0 = inlined_call_operand.vmem [shape: f32[8,32], index: 0, kind: input, shape index: {}]   ;;  %s655_s1 = inlined_call_operand.vmem [shape: f32[8,32], index: 1, kind: input, shape index: {}]   ;;  %s656_s2 = inlined_call_operand.vmem [shape: f32[8,5,32], index: 2, kind: input, shape index: {}]   ;;  %s657_s3 = inlined_call_operand.hbm [shape: f32[1,8,128], index: 3, kind: output, shape index: {}]  }
   0x1   :  { %v48_v2 = vunpack.c.l.s4 %v457_v1  ;;  %v15_v3 = vld [vmem:[%s654_s0] sm:$0xff] }
   0x2   :  { %v51_v4 = vshrl.u32 %v50_v0, 7  ;;  %v305_v5 = vand.u32 127, %v50_v0  ;;  %v46_v7 = vcombine.high %v15_v3, %v15_v3 }
   0x3   :  { %v49_v6 = vunpack.c.0.s8 %v48_v2 }
   0x4   :  { %v482_v8 = vsub.s32 %v305_v5, %v51_v4 }
   0x5   :  { %8 = vsyncpa [#allocation3], 0  ;;  %v52_v9 = vsub.s32 %v49_v6, %v51_v4  ;;  %v97_v11 = vsub.s32 0, %v51_v4  ;;  %v17_v17 = vld [vmem:[%s656_s2] sm:$0x1f]  ;;  %vm143_vm0 = vcmask 258048  }
   0x6   :  { %v19_v22 = vld [vmem:[%s656_s2 + $0x10] sm:$0x1f]  ;;  %v18_v23 = vld [vmem:[%s656_s2 + $0x8] sm:$0x1f]  ;;  %v21_v31 = vld [vmem:[%s656_s2 + $0x20] sm:$0x1f] }
   0x7   :  { %v53_v10 = vrot.slane %v15_v3, %v52_v9  ;;  %v60_v12 = vrot.slane %v46_v7, %v52_v9  ;;  %v22_v24 = vld [vmem:[%s656_s2 + $0x28] sm:$0x1f]  ;;  %v20_v38 = vld [vmem:[%s656_s2 + $0x18] sm:$0x1f]  ;;  %v23_v44 = vld [vmem:[%s656_s2 + $0x30] sm:$0x1f] }
   0x8   :  { %v24_v48 = vld [vmem:[%s656_s2 + $0x38] sm:$0x1f]  ;;  %v16_v51 = vld [vmem:[%s655_s1] sm:$0xff]  ;;  %vm26_vm1 = vcmask 261120   ;;  %vm338_vm4 = vcmask 1041409   ;;  %vm340_vm6 = vcmask 1042434  }
   0x9   :  { %v69_v13 = vrot.slane %v53_v10, %v52_v9  ;;  %v61_v14 = vcombine.high %v53_v10, %v53_v10  ;;  %v62_v15 = vcombine.high %v60_v12, %v60_v12  ;;  %v76_v16 = vrot.slane %v60_v12, %v52_v9  ;;  %s458_s1 = smov [#allocation2]  }
   0xa   :  { %v25_v55 = vmul.f32 %v16_v51, %v15_v3  ;;  %vm342_vm7 = vcmask 1043459   ;;  %vm344_vm13 = vcmask 1044484   ;;  %vm346_vm14 = vcmask 1045509   ;;  %s384_s2 = sshll.u32 %s458_s1, 4  ;;  %s385_s2 = int_to_ptr.vmem [resolvable:$true] %s384_s2 }
   0xb   :  { %v98_v18 = vrot.slane %v69_v13, %v97_v11  ;;  %v91_v19 = vcombine.high %v69_v13, %v69_v13  ;;  %v83_v20 = vrot.slane %v61_v14, %v52_v9  ;;  %v90_v21 = vrot.slane %v62_v15, %v52_v9  ;;  %s433_s5 = scalar_lea.vmem %s385_s2, 128  ;;  %p438_p1 = scmp.lt.s32.totalorder %s385_s2, %s385_s2 }
   0xc   :  { %v114_v25 = vrot.slane %v76_v16, %v97_v11  ;;  %v92_v26 = vcombine.high %v76_v16, %v76_v16  ;;  %v27_v57 = vsel %vm26_vm1, %v25_v55, 0.0  ;;  %vm348_vm15 = vcmask 1046534   ;;  %p434_p0 = scmp.ne.s32.totalorder %s385_s2, %s433_s5  ;;  %p439_p2 = scmp.lt.s32.totalorder %s433_s5, %s433_s5 }
   0xd   :  { %v135_v27 = vmul.f32 %v98_v18, %v17_v17  ;;  %v106_v28 = vrot.slane %v91_v19, %v97_v11  ;;  %v102_v29 = vrot.slane %v83_v20, %v97_v11  ;;  %v118_v30 = vrot.slane %v90_v21, %v97_v11 }
   0xe   :  { %v93_v32 = vcombine.high %v83_v20, %v83_v20  ;;  %v94_v33 = vcombine.high %v90_v21, %v90_v21  ;;  %v139_v42 = vmul.f32 %v114_v25, %v21_v31  ;;  %v122_v43 = vrot.slane %v92_v26, %v97_v11  ;;  %p440_p3 = por %p439_p2, %p438_p1 }
   0xf   :  { %v144_v34 = vsel %vm143_vm0, %v135_v27, 0.0  ;;  %v137_v35 = vmul.f32 %v106_v28, %v19_v22  ;;  %v136_v36 = vmul.f32 %v102_v29, %v18_v23  ;;  %v140_v37 = vmul.f32 %v118_v30, %v22_v24 }
  0x10   :  { %145 = vadd.xlane.f32.xlu0 %v144_v34  ;;  %v110_v39 = vrot.slane %v93_v32, %v97_v11  ;;  %v126_v47 = vrot.slane %v94_v33, %v97_v11  ;;  %v156_v49 = vsel %vm143_vm0, %v139_v42, 0.0  ;;  %v141_v50 = vmul.f32 %v122_v43, %v23_v44  ;;  %p441_p4 = pnand %p440_p3, %p434_p0 }
  0x11   :  { %v150_v40 = vsel %vm143_vm0, %v137_v35, 0.0  ;;  %v147_v41 = vsel %vm143_vm0, %v136_v36, 0.0  ;;  %v159_v45 = vsel %vm143_vm0, %v140_v37, 0.0  ;;  %vm353_vm1 = vcmask 39936  }
  0x12   :  { %151 = vadd.xlane.f32.xlu1 %v150_v40  ;;  %v138_v46 = vmul.f32 %v110_v39, %v20_v38  ;;  %v142_v53 = vmul.f32 %v126_v47, %v24_v48  ;;  %v162_v54 = vsel %vm143_vm0, %v141_v50, 0.0 }
  0x14   :  { %148 = vadd.xlane.f32.xlu0 %v147_v41  ;;  %v153_v52 = vsel %vm143_vm0, %v138_v46, 0.0  ;;  %v165_v56 = vsel %vm143_vm0, %v142_v53, 0.0  ;;  %vm350_vm0 = vcmask 1047559  }
  0x16   :  { %160 = vadd.xlane.f32.xlu1 %v159_v45 }
  0x18   :  { %157 = vadd.xlane.f32.xlu0 %v156_v49 }
  0x1a   :  { %154 = vadd.xlane.f32.xlu1 %v153_v52 }
  0x1c   :  { %163 = vadd.xlane.f32.xlu0 %v162_v54 }
  0x1e   :  { %166 = vadd.xlane.f32.xlu1 %v165_v56 }
  0x20   :  { %28 = vadd.xlane.f32.xlu0 %v27_v57 }
  0x9d   :  { %v519_v58 = vpop.xlane.xlu0 %145 }
  0x9e   :  { %v168_v59 = vsub.f32 0.0, %v519_v58 }
  0x9f   :  { %v152_v60 = vpop.xlane.xlu1 %151 }
  0xa0   :  { %v184_v61 = vand.u32 2147483647, %v168_v59  ;;  %v170_v62 = vsub.f32 0.0, %v152_v60  ;;  %v176_v47 = vmin.f32 %v168_v59, 0.0 }
  0xa1   :  { %v522_v63 = vpop.xlane.xlu0 %148 }
  0xa2   :  { %v192_v0 = vsub.f32 0.0, %v184_v61  ;;  %v186_v1 = vand.u32 2147483647, %v170_v62  ;;  %v169_v2 = vsub.f32 0.0, %v522_v63  ;;  %v554_v48 = vmin.f32 %v170_v62, 0.0 }
  0xa3   :  { %v525_v3 = vpop.xlane.xlu1 %160 }
  0xa4   :  { %v200_v4 = vmul.f32 1.442695, %v192_v0  ;;  %v194_v5 = vsub.f32 0.0, %v186_v1  ;;  %v185_v6 = vand.u32 2147483647, %v169_v2  ;;  %v173_v7 = vsub.f32 0.0, %v525_v3 }
  0xa5   :  { %v528_v9 = vpop.xlane.xlu0 %157  ;;  %v177_v53 = vmin.f32 %v169_v2, 0.0 }
  0xa6   :  { %397 = vpow2.f32 %v200_v4  ;;  %v204_v10 = vmul.f32 1.442695, %v194_v5  ;;  %v193_v11 = vsub.f32 0.0, %v185_v6  ;;  %v172_v12 = vsub.f32 0.0, %v528_v9 }
  0xa7   :  { %v189_v13 = vand.u32 2147483647, %v173_v7  ;;  %v533_v14 = vpop.xlane.xlu1 %154  ;;  %v565_v62 = vmin.f32 %v173_v7, 0.0 }
  0xa8   :  { %399 = vpow2.f32 %v204_v10  ;;  %v202_v15 = vmul.f32 1.442695, %v193_v11  ;;  %v188_v16 = vand.u32 2147483647, %v172_v12  ;;  %v171_v18 = vsub.f32 0.0, %v533_v14 }
  0xa9   :  { %v197_v17 = vsub.f32 0.0, %v189_v13  ;;  %v538_v19 = vpop.xlane.xlu0 %163  ;;  %v180_v2 = vmin.f32 %v172_v12, 0.0 }
  0xaa   :  { %401 = vpow2.f32 %v202_v15  ;;  %v196_v20 = vsub.f32 0.0, %v188_v16  ;;  %v174_v21 = vsub.f32 0.0, %v538_v19  ;;  %v187_v23 = vand.u32 2147483647, %v171_v18 }
  0xab   :  { %v210_v22 = vmul.f32 1.442695, %v197_v17  ;;  %v541_v24 = vpop.xlane.xlu1 %166  ;;  %v572_v4 = vmin.f32 %v171_v18, 0.0 }
  0xac   :  { %v208_v25 = vmul.f32 1.442695, %v196_v20  ;;  %v190_v26 = vand.u32 2147483647, %v174_v21  ;;  %v175_v27 = vsub.f32 0.0, %v541_v24  ;;  %v195_v28 = vsub.f32 0.0, %v187_v23 }
  0xad   :  { %403 = vpow2.f32 %v210_v22 }
  0xae   :  { %405 = vpow2.f32 %v208_v25  ;;  %v198_v29 = vsub.f32 0.0, %v190_v26  ;;  %v191_v30 = vand.u32 2147483647, %v175_v27  ;;  %v206_v31 = vmul.f32 1.442695, %v195_v28 }
  0xb0   :  { %v398_v32 = vpop.eup %397  ;;  %v212_v33 = vmul.f32 1.442695, %v198_v29  ;;  %v199_v34 = vsub.f32 0.0, %v191_v30  ;;  %407 = vpow2.f32 %v206_v31 }
  0xb1   :  { %v216_v35 = vadd.f32 1.0, %v398_v32  ;;  %v219_v42 = vmul.f32 -0.5, %v398_v32  ;;  %v222_v52 = vand.u32 2147483647, %v398_v32 }
  0xb2   :  { %v400_v36 = vpop.eup %399  ;;  %409 = vpow2.f32 %v212_v33  ;;  %v214_v37 = vmul.f32 1.442695, %v199_v34 }
  0xb3   :  { %411 = vlog2.f32 %v216_v35  ;;  %v234_v38 = vadd.f32 1.0, %v400_v36  ;;  %v237_v45 = vmul.f32 -0.5, %v400_v36  ;;  %v220_v51 = vadd.f32 1.0, %v219_v42 }
  0xb4   :  { %v402_v39 = vpop.eup %401  ;;  %413 = vpow2.f32 %v214_v37  ;;  %v240_v55 = vand.u32 2147483647, %v400_v36  ;;  %vm574_vm2 = vcmp.lt.f32.partialorder %v222_v52, 0.0004427343 }
  0xb5   :  { %415 = vlog2.f32 %v234_v38  ;;  %v225_v40 = vadd.f32 1.0, %v402_v39  ;;  %v228_v49 = vmul.f32 -0.5, %v402_v39  ;;  %v238_v60 = vadd.f32 1.0, %v237_v45 }
  0xb6   :  { %v231_v61 = vand.u32 2147483647, %v402_v39  ;;  %v221_v7 = vmul.f32 %v398_v32, %v220_v51  ;;  %vm579_vm3 = vcmp.lt.f32.partialorder %v240_v55, 0.0004427343  ;;  %v182_v45 = vmin.f32 %v174_v21, 0.0 }
  0xb7   :  { %v548_v41 = vpop.eup %403  ;;  %417 = vlog2.f32 %v225_v40  ;;  %v229_v1 = vadd.f32 1.0, %v228_v49  ;;  %v239_v14 = vmul.f32 %v400_v36, %v238_v60 }
  0xb8   :  { %v550_v43 = vpop.eup %405  ;;  %v261_v44 = vadd.f32 1.0, %v548_v41  ;;  %v264_v56 = vmul.f32 -0.5, %v548_v41  ;;  %vm583_vm5 = vcmp.lt.f32.partialorder %v231_v61, 0.0004427343  ;;  %v267_v25 = vand.u32 2147483647, %v548_v41 }
  0xb9   :  { %v252_v46 = vadd.f32 1.0, %v550_v43  ;;  %v255_v57 = vmul.f32 -0.5, %v550_v43  ;;  %v230_v20 = vmul.f32 %v402_v39, %v229_v1  ;;  %v258_v26 = vand.u32 2147483647, %v550_v43 }
  0xba   :  { %419 = vlog2.f32 %v261_v44  ;;  %v556_v50 = vpop.eup %407  ;;  %v265_v13 = vadd.f32 1.0, %v264_v56  ;;  %vm602_vm8 = vcmp.lt.f32.partialorder %v267_v25, 0.0004427343 }
  0xbb   :  { %421 = vlog2.f32 %v252_v46  ;;  %v243_v58 = vadd.f32 1.0, %v556_v50  ;;  %v256_v9 = vadd.f32 1.0, %v255_v57  ;;  %v246_v16 = vmul.f32 -0.5, %v556_v50 }
  0xbc   :  { %v558_v54 = vpop.eup %409  ;;  %v266_v31 = vmul.f32 %v548_v41, %v265_v13  ;;  %v249_v33 = vand.u32 2147483647, %v556_v50  ;;  %vm606_vm9 = vcmp.lt.f32.partialorder %v258_v26, 0.0004427343 }
  0xbd   :  { %v412_v59 = vpop.eup %411  ;;  %v270_v63 = vadd.f32 1.0, %v558_v54  ;;  %423 = vlog2.f32 %v243_v58  ;;  %v273_v22 = vmul.f32 -0.5, %v558_v54  ;;  %v257_v32 = vmul.f32 %v550_v43, %v256_v9 }
  0xbe   :  { %v568_v0 = vpop.eup %413  ;;  %v218_v6 = vmul.f32 0.6931472, %v412_v59  ;;  %v247_v37 = vadd.f32 1.0, %v246_v16  ;;  %v276_v38 = vand.u32 2147483647, %v558_v54 }
  0xbf   :  { %v416_v5 = vpop.eup %415  ;;  %425 = vlog2.f32 %v270_v63  ;;  %v279_v3 = vadd.f32 1.0, %v568_v0  ;;  %v282_v28 = vmul.f32 -0.5, %v568_v0  ;;  %v274_v44 = vadd.f32 1.0, %v273_v22 }
  0xc0   :  { %v236_v17 = vmul.f32 0.6931472, %v416_v5  ;;  %v224_v23 = vsel %vm574_vm2, %v221_v7, %v218_v6  ;;  %vm617_vm10 = vcmp.lt.f32.partialorder %v249_v33, 0.0004427343  ;;  %v248_v19 = vmul.f32 %v556_v50, %v247_v37 }
  0xc1   :  { %v418_v12 = vpop.eup %417  ;;  %427 = vlog2.f32 %v279_v3  ;;  %v288_v39 = vsub.f32 %v176_v47, %v224_v23  ;;  %v283_v46 = vadd.f32 1.0, %v282_v28  ;;  %v285_v21 = vand.u32 2147483647, %v568_v0 }
  0xc2   :  { %v227_v18 = vmul.f32 0.6931472, %v418_v12  ;;  %v242_v40 = vsel %vm579_vm3, %v239_v14, %v236_v17  ;;  %v275_v60 = vmul.f32 %v558_v54, %v274_v44  ;;  %vm277_vm11 = vcmp.lt.f32.partialorder %v276_v38, 0.0004427343 }
  0xc3   :  { %v290_v56 = vsub.f32 %v554_v48, %v242_v40  ;;  %v309_v58 = vrot.slane %v288_v39, %v482_v8  ;;  %v284_v48 = vmul.f32 %v568_v0, %v283_v46  ;;  %v183_v54 = vmin.f32 %v175_v27, 0.0 }
  0xc4   :  { %v420_v29 = vpop.eup %419  ;;  %v233_v30 = vsel %vm583_vm5, %v230_v20, %v227_v18  ;;  %vm286_vm12 = vcmp.lt.f32.partialorder %v285_v21, 0.0004427343  ;;  %v29_v20 = vpop.xlane.xlu0 %28  ;;  %vm365_vm3 = vcmask 7168  }
  0xc5   :  { %v422_v34 = vpop.eup %421  ;;  %v289_v35 = vsub.f32 %v177_v53, %v233_v30  ;;  %v263_v36 = vmul.f32 0.6931472, %v420_v29  ;;  %v317_v7 = vrot.slane %v290_v56, %v482_v8  ;;  %v31_v22 = vand.u32 2147483647, %v29_v20 }
  0xc6   :  { %v254_v42 = vmul.f32 0.6931472, %v422_v34  ;;  %v30_v34 = vmin.f32 %v29_v20, 0.0 }
  0xc7   :  { %v424_v49 = vpop.eup %423  ;;  %v313_v47 = vrot.slane %v289_v35, %v482_v8  ;;  %v269_v51 = vsel %vm602_vm8, %v266_v31, %v263_v36  ;;  %v32_v23 = vsub.f32 0.0, %v31_v22 }
  0xc8   :  { %v260_v52 = vsel %vm606_vm9, %v257_v32, %v254_v42  ;;  %v245_v57 = vmul.f32 0.6931472, %v424_v49  ;;  %v293_v63 = vsub.f32 %v565_v62, %v269_v51 }
  0xc9   :  { %v426_v55 = vpop.eup %425  ;;  %v292_v1 = vsub.f32 %v180_v2, %v260_v52  ;;  %v339_v6 = vsel %vm338_vm4, %v313_v47, %v309_v58  ;;  %v33_v25 = vmul.f32 1.442695, %v32_v23 }
  0xca   :  { %v272_v59 = vmul.f32 0.6931472, %v426_v55  ;;  %v251_v5 = vsel %vm617_vm10, %v248_v19, %v245_v57  ;;  %v329_v12 = vrot.slane %v293_v63, %v482_v8 }
  0xcb   :  { %v428_v61 = vpop.eup %427  ;;  %v291_v50 = vsub.f32 %v572_v4, %v251_v5  ;;  %v325_v0 = vrot.slane %v292_v1, %v482_v8  ;;  %v341_v4 = vsel %vm340_vm6, %v317_v7, %v339_v6  ;;  %429 = vpow2.f32 %v33_v25 }
  0xcc   :  { %v278_v10 = vsel %vm277_vm11, %v275_v60, %v272_v59  ;;  %v281_v3 = vmul.f32 0.6931472, %v428_v61 }
  0xcd   :  { %v294_v11 = vsub.f32 %v182_v45, %v278_v10  ;;  %v321_v62 = vrot.slane %v291_v50, %v482_v8 }
  0xce   :  { %v287_v2 = vsel %vm286_vm12, %v284_v48, %v281_v3 }
  0xcf   :  { %v333_v13 = vrot.slane %v294_v11, %v482_v8  ;;  %v295_v9 = vsub.f32 %v183_v54, %v287_v2  ;;  %v343_v14 = vsel %vm342_vm7, %v321_v62, %v341_v4 }
  0xd0   :  { %v345_v27 = vsel %vm344_vm13, %v325_v0, %v343_v14 }
  0xd1   :  { %v337_v24 = vrot.slane %v295_v9, %v482_v8  ;;  %v347_v15 = vsel %vm346_vm14, %v329_v12, %v345_v27 }
  0xd2   :  { %v349_v16 = vsel %vm348_vm15, %v333_v13, %v347_v15 }
  0xd3   :  { %v351_v17 = vsel %vm350_vm0, %v337_v24, %v349_v16 }
  0xd4   :  { %v354_v18 = vsel %vm353_vm1, %v351_v17, 0.0 }
  0xd5   :  { %355 = vadd.xlane.f32.xlu1 %v354_v18  ;;  %v430_v26 = vpop.eup %429 }
  0xd6   :  { %v35_v28 = vadd.f32 1.0, %v430_v26  ;;  %v38_v29 = vmul.f32 -0.5, %v430_v26  ;;  %v41_v8 = vand.u32 2147483647, %v430_v26 }
  0xd8   :  { %431 = vlog2.f32 %v35_v28  ;;  %v39_v30 = vadd.f32 1.0, %v38_v29  ;;  %vm42_vm2 = vcmp.lt.f32.partialorder %v41_v8, 0.0004427343 }
  0xda   :  { %v40_v33 = vmul.f32 %v430_v26, %v39_v30 }
  0xe2   :  { %v432_v31 = vpop.eup %431 }
  0xe3   :  { %v37_v32 = vmul.f32 0.6931472, %v432_v31 }
  0xe5   :  { %v43_v35 = vsel %vm42_vm2, %v40_v33, %v37_v32 }
  0xe6   :  { %v44_v36 = vsub.f32 %v30_v34, %v43_v35 }
 0x162   :  { %v356_v37 = vpop.xlane.xlu1 %355 }
 0x163   :  { %v357_v38 = vadd.f32 %v356_v37, %v44_v36 }
 0x165   :  { %v366_v39 = vsel %vm365_vm3, %v357_v38, 0.0 }
 0x166   :  { %367 = vadd.xlane.f32.xlu0 %v366_v39 }
 0x1f3   :  { %v368_v40 = vpop.xlane.xlu0 %367 }
 0x1f4   :  { %v369_v42 = vrot.slane %v368_v40, 4 }
 0x1f6   :  { %v370_v44 = vadd.f32 %v369_v42, %v368_v40 }
 0x1f8   :  { %v371_v41 = vrot.slane %v370_v44, 2 }
 0x1fa   :  { %v372_v43 = vadd.f32 %v371_v41, %v370_v44 }
 0x1fc   :  { %v373_v45 = vrot.slane %v372_v43, 1 }
 0x1fe   :  { %v374_v46 = vadd.f32 %v373_v45, %v372_v43 }
 0x200   :  { %392 = vpush %v374_v46 }
 0x231   :  { %s393_s4 = spop %392 }
 0x232   :  { %v376_v49 = vstv %s393_s4 }
 0x233   :  { %377 = vst [vmem:[#allocation2] sm:$0xff] %v376_v49 }
 0x234   :  { %444 = shalt.err (!%p441_p4)
}
 0x235   :  { %s445_s8 = scalar_lea.hbm %s657_s3, 128 }
 0x236   :  { %p446_p5 = scmp.ne.s32.totalorder %s657_s3, %s445_s8  ;;  %p449_p6 = scmp.lt.u32.totalorder %s445_s8, %s657_s3 }
 0x238   :  { %p451_p7 = pnand %p449_p6, %p446_p5 }
 0x23a   :  { %454 = shalt.err (!%p451_p7)
}
 0x23b   :  { %387 = dma.vmem_to_hbm [thread:$0]  %s385_s2, 128, %s657_s3, [#allocation3]  }
 0x23c   :  { %455 = dma.done.wait [#allocation3], 128  }
 0x23d   :  { %456 = vsyncadd [#allocation3], 4294967168 }
 0x23e   :  { %391 = vsyncpa [#allocation3], 1 }

</bundles_post_ra>
